<compile_context>
chip_gen: v7x
topology: tpu7x:2x2x1
jax: 0.10.0
libtpu: 0.0.40
codegen_flags: <defaults>
</compile_context>

<pallas_src>
import functools

import jax
import jax.numpy as jnp
from jax.experimental import pallas as pl
from jax.experimental.pallas import tpu as pltpu


_LANES = 128


# ---------------------------------------------------------------------------
# VMEM budgeting (generation-aware).
# ---------------------------------------------------------------------------
def _vmem_budget():
    try:
        cap = int(pltpu.get_tpu_info().vmem_capacity_bytes)
    except Exception:
        cap = 64 * 1024 * 1024                     # conservative fallback: v7x per-TC VMEM
    limit = min(cap * 3 // 4, 96 * 1024 * 1024)    # scoped limit we request from Mosaic
    budget = limit // 2                            # modeled working-set budget for tiles
    return budget, limit


def _choose_tile_rows(num_rows, lane_width, in_itemsize, budget_bytes):
    """Rows per grid step: big enough to amortize ~0.35us/step, small enough for VMEM.

    Per-row working-set model (lanes padded to a multiple of 128 in VMEM):
      2 inputs x 2 pipeline buffers x in_itemsize
      + ~12 f32/i32 in-kernel temporaries (upcast logits, exp, masks, iotas, ...)
      + 2 output buffers x 4 bytes (output lane-padded to 128).
    """
    padded = ((max(lane_width, 1) + _LANES - 1) // _LANES) * _LANES
    per_row = padded * (2 * 2 * in_itemsize + 12 * 4) + 2 * _LANES * 4
    tile = budget_bytes // per_row
    tile = max(16, (min(int(tile), 4096) // 16) * 16)   # multiple of 16 (bf16 packing)
    return min(tile, num_rows)


# ---------------------------------------------------------------------------
# General kernel: any C (used for C >= 128 or C not dividing 128).
# ---------------------------------------------------------------------------
def _ce_kernel_general(pred_ref, true_ref, out_ref, *, assume_one_hot):
    logits = pred_ref[...].astype(jnp.float32)              # [TR, C]
    labels = true_ref[...].astype(jnp.float32)              # [TR, C]
    C = logits.shape[-1]

    # Numerically stable logsumexp along the class (lane) dim.
    m = jnp.max(logits, axis=-1, keepdims=True)
    lse = jnp.log(jnp.sum(jnp.exp(logits - m), axis=-1, keepdims=True)) + m

    if assume_one_hot:
        tgt = jnp.sum(labels * logits, axis=-1, keepdims=True)
    else:
        # torch.argmax semantics (first max wins) on arbitrary y_true rows.
        col = jax.lax.broadcasted_iota(jnp.int32, labels.shape, 1)
        row_max = jnp.max(labels, axis=-1, keepdims=True)
        first_max = jnp.min(jnp.where(labels == row_max, col, C),
                            axis=-1, keepdims=True)
        tgt = jnp.sum(jnp.where(col == first_max, logits, 0.0),
                      axis=-1, keepdims=True)

    # [TR, 1] column output: for C >= 128 this is <= 1/256 of the input bytes, so
    # the masked single-lane stores are negligible and we avoid an in-kernel
    # sublane->lane relayout.  Small C goes to the packed kernel below.
    out_ref[...] = (lse - tgt).astype(out_ref.dtype)


# ---------------------------------------------------------------------------
# Packed kernel: C < 128 and C | 128 -> k = 128//C rows per 128-lane group.
# ---------------------------------------------------------------------------
def _ce_kernel_packed(pred_ref, true_ref, out_ref, *, num_classes, assume_one_hot):
    C = num_classes
    x = pred_ref[...].astype(jnp.float32)                    # [TR, 128] packed logits
    lab = true_ref[...].astype(jnp.float32)                  # [TR, 128] packed labels
    lanes = x.shape[-1]

    lane = jax.lax.broadcasted_iota(jnp.int32, x.shape, 1)
    seg_pos = (lane & (C - 1)).astype(jnp.float32)           # position inside segment
    seg_start = (lane - (lane & (C - 1))).astype(jnp.float32)  # segment id (start lane)

    # Per (log-step, direction) "value came from my own segment" masks, shared by all
    # segmented reductions below.  Rolling the segment id alongside the data makes the
    # masks independent of the roll direction convention.
    steps = []
    s = 1
    while s < C:
        fa = pltpu.roll(seg_start, shift=s, axis=1) == seg_start
        fb = pltpu.roll(seg_start, shift=lanes - s, axis=1) == seg_start
        steps.append((s, fa, fb))
        s *= 2

    def seg_allreduce(v, combine):
        # Idempotent combine (max/min): every lane ends with its segment's reduction.
        for s, fa, fb in steps:
            v = combine(v, jnp.where(fa, pltpu.roll(v, shift=s, axis=1), v))
            v = combine(v, jnp.where(fb, pltpu.roll(v, shift=lanes - s, axis=1), v))
        return v

    def seg_allsum(v):
        # Two masked Hillis-Steele scans (one per roll direction); inclusive prefix +
        # inclusive suffix - self = full segment sum in every lane, independent of
        # which direction is which.
        va = v
        vb = v
        for s, fa, fb in steps:
            va = va + jnp.where(fa, pltpu.roll(va, shift=s, axis=1), 0.0)
            vb = vb + jnp.where(fb, pltpu.roll(vb, shift=lanes - s, axis=1), 0.0)
        return va + vb - v

    m = seg_allreduce(x, jnp.maximum)                 # segment max (replicated)
    denom = seg_allsum(jnp.exp(x - m))                # segment sum(exp) (replicated)

    if assume_one_hot:
        tgt = seg_allsum(lab * x)                     # strict one-hot target gather
    else:
        # torch.argmax semantics (first max wins) on arbitrary y_true rows.
        lab_max = seg_allreduce(lab, jnp.maximum)
        cand = jnp.where(lab == lab_max, seg_pos, float(C))
        first_max = seg_allreduce(cand, jnp.minimum)
        tgt = seg_allsum(jnp.where(seg_pos == first_max, x, 0.0))

    loss = jnp.log(denom) + m - tgt                   # [TR, 128], replicated per segment

    # Compact one loss per segment into a [TR, k] tile on the otherwise-idle MXU:
    # sel[l, j] = (l == j*C) picks lane j*C of each segment (one nonzero product per
    # output element -> exact at HIGHEST precision).
    k = lanes // C
    row = jax.lax.broadcasted_iota(jnp.int32, (lanes, k), 0)
    col = jax.lax.broadcasted_iota(jnp.int32, (lanes, k), 1)
    sel = (row == col * C).astype(jnp.float32)
    out_ref[...] = jnp.dot(loss, sel,
                           precision=jax.lax.Precision.HIGHEST,
                           preferred_element_type=jnp.float32).astype(out_ref.dtype)


# ---------------------------------------------------------------------------
# Wrappers.
# ---------------------------------------------------------------------------
def _ce_rows_general(pred2d, true2d, assume_one_hot, tile_rows=None):
    R, C = pred2d.shape
    budget, vmem_limit = _vmem_budget()
    tr = tile_rows if tile_rows is not None else _choose_tile_rows(
        R, C, pred2d.dtype.itemsize, budget)
    tr = min(tr, R)
    grid = (pl.cdiv(R, tr),)
    # TODO(synk): for vocab-scale C, add a second 'arbitrary' grid axis over C chunks
    # with online logsumexp/argmax accumulators (pl.when init/finalize) instead of
    # shrinking the row tile.
    out = pl.pallas_call(
        functools.partial(_ce_kernel_general, assume_one_hot=assume_one_hot),
        out_shape=jax.ShapeDtypeStruct((R, 1), jnp.float32),
        grid=grid,
        in_specs=[pl.BlockSpec((tr, C), lambda i: (i, 0)),
                  pl.BlockSpec((tr, C), lambda i: (i, 0))],
        out_specs=pl.BlockSpec((tr, 1), lambda i: (i, 0)),
        compiler_params=pltpu.CompilerParams(
            dimension_semantics=("parallel",),        # v7x: shard rows over both TCs
            vmem_limit_bytes=vmem_limit),
    )(pred2d, true2d)
    return out[:, 0]


def _ce_rows_packed(pred2d, true2d, assume_one_hot, tile_rows=None):
    R, C = pred2d.shape
    k = _LANES // C
    Rp = pl.cdiv(R, k)
    pad = Rp * k - R
    if pad:
        # Tiny tail pad (< k zero rows) so k rows pack exactly into one 128-lane group.
        pred2d = jnp.pad(pred2d, ((0, pad), (0, 0)))
        true2d = jnp.pad(true2d, ((0, pad), (0, 0)))
    pred_p = pred2d.reshape(Rp, k * C)     # contiguous row-major repack (no transpose)
    true_p = true2d.reshape(Rp, k * C)

    budget, vmem_limit = _vmem_budget()
    tr = tile_rows if tile_rows is not None else _choose_tile_rows(
        Rp, _LANES, pred_p.dtype.itemsize, budget)
    tr = min(tr, Rp)
    grid = (pl.cdiv(Rp, tr),)
    out = pl.pallas_call(
        functools.partial(_ce_kernel_packed, num_classes=C,
                          assume_one_hot=assume_one_hot),
        out_shape=jax.ShapeDtypeStruct((Rp, k), jnp.float32),
        grid=grid,
        in_specs=[pl.BlockSpec((tr, k * C), lambda i: (i, 0)),
                  pl.BlockSpec((tr, k * C), lambda i: (i, 0))],
        out_specs=pl.BlockSpec((tr, k), lambda i: (i, 0)),
        compiler_params=pltpu.CompilerParams(
            dimension_semantics=("parallel",),        # v7x: shard rows over both TCs
            vmem_limit_bytes=vmem_limit),
    )(pred_p, true_p)
    return out.reshape(-1)[:R]


def _ce_rows(pred2d, true2d, assume_one_hot=False, tile_rows=None):
    """Per-row cross entropy for [R, C] logits / labels -> [R] float32 losses."""
    _, C = pred2d.shape
    if C < _LANES and _LANES % C == 0:
        return _ce_rows_packed(pred2d, true2d, assume_one_hot, tile_rows)
    return _ce_rows_general(pred2d, true2d, assume_one_hot, tile_rows)


def _out_shape(shape):
    """Mirror the PyTorch module's recursion to determine the output shape."""
    if len(shape) == 1:
        return ()
    if len(shape) > 2:
        if shape[1] > 1:
            inner = _out_shape((shape[0],) + tuple(shape[2:]))
            return (inner[0], shape[1]) + tuple(inner[1:])
        else:
            return _out_shape((shape[0],) + tuple(shape[2:]))
    return (shape[0],)


def cross_entropy_loss(y_pred, y_true, reduction="none", assume_one_hot=False):
    """JAX/Pallas equivalent of CrossEntropyLoss.forward (reduction='none').

    Losses are returned in float32.  `assume_one_hot=True` enables a faster target
    gather that is only valid for strict one-hot y_true rows; the default keeps
    torch.argmax (first-max-wins) semantics for arbitrary rows.
    """
    if reduction != "none":
        # TODO(synk): only reduction='none' (the module default) is implemented.
        raise NotImplementedError("only reduction='none' is supported")
    y_true = jnp.reshape(y_true, y_pred.shape)
    C = y_pred.shape[-1]
    losses = _ce_rows(y_pred.reshape(-1, C), y_true.reshape(-1, C),
                      assume_one_hot=assume_one_hot)
    return losses.reshape(_out_shape(y_pred.shape))


def _reference(y_pred, y_true):
    y_true = jnp.reshape(y_true, y_pred.shape)
    tgt = jnp.argmax(y_true, axis=-1)
    logp = jax.nn.log_softmax(y_pred.astype(jnp.float32), axis=-1)
    loss = -jnp.take_along_axis(logp, tgt[..., None], axis=-1)[..., 0]
    return loss.reshape(_out_shape(y_pred.shape))


if __name__ == "__main__":
    key = jax.random.PRNGKey(0)
    k1, k2, k3, k4, k5, k6 = jax.random.split(key, 6)

    # Case 1: 3-D logits with flattened one-hot targets (.view path + recursion output
    # shape).  C=8 -> packed path (16 rows per 128-lane group) with a zero tail pad
    # (R=8 < 16) that must not leak into real rows.
    N, M, C = 2, 4, 8
    y_pred = jax.random.normal(k1, (N, M, C), dtype=jnp.float32)
    tgt_idx = jax.random.randint(k2, (N, M), 0, C)
    y_true = jax.nn.one_hot(tgt_idx, C, dtype=jnp.float32).reshape(N, M * C)
    out = jax.block_until_ready(cross_entropy_loss(y_pred, y_true))
    ref = _reference(y_pred, y_true)
    assert out.shape == (N, M), out.shape
    assert jnp.allclose(out, ref, atol=1e-5, rtol=1e-5), (out, ref)

    # Case 2: packed path with several 128-lane groups (C=16 -> 8 rows per group),
    # bf16 logits over the wire, plus the strict one-hot fast path.
    R2, C2 = 40, 16
    p2 = jax.random.normal(k3, (R2, C2), dtype=jnp.bfloat16)
    t2 = jax.nn.one_hot(jax.random.randint(k4, (R2,), 0, C2), C2, dtype=jnp.float32)
    out2 = jax.block_until_ready(_ce_rows(p2, t2))
    ref2 = _reference(p2, t2)
    assert out2.shape == (R2,), out2.shape
    assert jnp.allclose(out2, ref2, atol=1e-5, rtol=1e-5), (out2, ref2)
    out2b = jax.block_until_ready(_ce_rows(p2, t2, assume_one_hot=True))
    assert jnp.allclose(out2b, ref2, atol=1e-5, rtol=1e-5), (out2b, ref2)

    # Case 3: general (unpacked) path: C=200 does not divide 128 (exercises the
    # lane-padding masking on hardware), with a forced small row tile so the last
    # input/output blocks are ragged (no host-side padding).
    R3, C3 = 44, 200
    p3 = jax.random.normal(k5, (R3, C3), dtype=jnp.float32)
    t3 = jax.nn.one_hot(jax.random.randint(k6, (R3,), 0, C3), C3, dtype=jnp.float32)
    out3 = jax.block_until_ready(_ce_rows(p3, t3, tile_rows=16))
    ref3 = _reference(p3, t3)
    assert out3.shape == (R3,), out3.shape
    assert jnp.allclose(out3, ref3, atol=1e-5, rtol=1e-5), (out3, ref3)

    print("KERNEL_OK")
</pallas_src>

<mosaic_0001>
module attributes {stable_mosaic.version = 11 : i64} {
  func.func @_ce_kernel_packed(%arg0: i32, %arg1: memref<1x128xf32, #tpu.memory_space<vmem>>, %arg2: memref<1x128xf32, #tpu.memory_space<vmem>>, %arg3: memref<1x16xf32, #tpu.memory_space<vmem>>) attributes {dimension_semantics = [#tpu.dimension_semantics<parallel>], iteration_bounds = array<i64: 1>, scalar_prefetch = 0 : i64, scratch_operands = 0 : i64, tpu.core_type = #tpu.core_type<tc>, window_params = [{transform_indices = @transform_0, window_bounds = array<i64: 1, 128>}, {transform_indices = @transform_1, window_bounds = array<i64: 1, 128>}, {transform_indices = @transform_2, window_bounds = array<i64: 1, 16>}]} {
    %c0 = arith.constant 0 : index
    %c0_0 = arith.constant 0 : index
    %0 = vector.load %arg1[%c0, %c0_0] : memref<1x128xf32, #tpu.memory_space<vmem>>, vector<1x128xf32>
    %c0_1 = arith.constant 0 : index
    %c0_2 = arith.constant 0 : index
    %1 = vector.load %arg2[%c0_1, %c0_2] : memref<1x128xf32, #tpu.memory_space<vmem>>, vector<1x128xf32>
    %2 = tpu.iota {dimensions = array<i32: 1>} : vector<1x128xi32>
    %c7_i32 = arith.constant 7 : i32
    %3 = vector.broadcast %c7_i32 : i32 to vector<1x128xi32>
    %4 = arith.andi %2, %3 : vector<1x128xi32>
    %5 = arith.sitofp %4 : vector<1x128xi32> to vector<1x128xf32>
    %c7_i32_3 = arith.constant 7 : i32
    %6 = vector.broadcast %c7_i32_3 : i32 to vector<1x128xi32>
    %7 = arith.andi %2, %6 : vector<1x128xi32>
    %8 = arith.subi %2, %7 : vector<1x128xi32>
    %9 = arith.sitofp %8 : vector<1x128xi32> to vector<1x128xf32>
    %c1_i32 = arith.constant 1 : i32
    %10 = tpu.dynamic_rotate %9 by %c1_i32 dim 1 : vector<1x128xf32>, i32 -> vector<1x128xf32>
    %11 = arith.cmpf oeq, %10, %9 : vector<1x128xf32>
    %c127_i32 = arith.constant 127 : i32
    %12 = tpu.dynamic_rotate %9 by %c127_i32 dim 1 : vector<1x128xf32>, i32 -> vector<1x128xf32>
    %13 = arith.cmpf oeq, %12, %9 : vector<1x128xf32>
    %c2_i32 = arith.constant 2 : i32
    %14 = tpu.dynamic_rotate %9 by %c2_i32 dim 1 : vector<1x128xf32>, i32 -> vector<1x128xf32>
    %15 = arith.cmpf oeq, %14, %9 : vector<1x128xf32>
    %c126_i32 = arith.constant 126 : i32
    %16 = tpu.dynamic_rotate %9 by %c126_i32 dim 1 : vector<1x128xf32>, i32 -> vector<1x128xf32>
    %17 = arith.cmpf oeq, %16, %9 : vector<1x128xf32>
    %c4_i32 = arith.constant 4 : i32
    %18 = tpu.dynamic_rotate %9 by %c4_i32 dim 1 : vector<1x128xf32>, i32 -> vector<1x128xf32>
    %19 = arith.cmpf oeq, %18, %9 : vector<1x128xf32>
    %c124_i32 = arith.constant 124 : i32
    %20 = tpu.dynamic_rotate %9 by %c124_i32 dim 1 : vector<1x128xf32>, i32 -> vector<1x128xf32>
    %21 = arith.cmpf oeq, %20, %9 : vector<1x128xf32>
    %c1_i32_4 = arith.constant 1 : i32
    %22 = tpu.dynamic_rotate %0 by %c1_i32_4 dim 1 : vector<1x128xf32>, i32 -> vector<1x128xf32>
    %23 = arith.select %11, %22, %0 : vector<1x128xi1>, vector<1x128xf32>
    %24 = arith.maximumf %0, %23 : vector<1x128xf32>
    %c127_i32_5 = arith.constant 127 : i32
    %25 = tpu.dynamic_rotate %24 by %c127_i32_5 dim 1 : vector<1x128xf32>, i32 -> vector<1x128xf32>
    %26 = arith.select %13, %25, %24 : vector<1x128xi1>, vector<1x128xf32>
    %27 = arith.maximumf %24, %26 : vector<1x128xf32>
    %c2_i32_6 = arith.constant 2 : i32
    %28 = tpu.dynamic_rotate %27 by %c2_i32_6 dim 1 : vector<1x128xf32>, i32 -> vector<1x128xf32>
    %29 = arith.select %15, %28, %27 : vector<1x128xi1>, vector<1x128xf32>
    %30 = arith.maximumf %27, %29 : vector<1x128xf32>
    %c126_i32_7 = arith.constant 126 : i32
    %31 = tpu.dynamic_rotate %30 by %c126_i32_7 dim 1 : vector<1x128xf32>, i32 -> vector<1x128xf32>
    %32 = arith.select %17, %31, %30 : vector<1x128xi1>, vector<1x128xf32>
    %33 = arith.maximumf %30, %32 : vector<1x128xf32>
    %c4_i32_8 = arith.constant 4 : i32
    %34 = tpu.dynamic_rotate %33 by %c4_i32_8 dim 1 : vector<1x128xf32>, i32 -> vector<1x128xf32>
    %35 = arith.select %19, %34, %33 : vector<1x128xi1>, vector<1x128xf32>
    %36 = arith.maximumf %33, %35 : vector<1x128xf32>
    %c124_i32_9 = arith.constant 124 : i32
    %37 = tpu.dynamic_rotate %36 by %c124_i32_9 dim 1 : vector<1x128xf32>, i32 -> vector<1x128xf32>
    %38 = arith.select %21, %37, %36 : vector<1x128xi1>, vector<1x128xf32>
    %39 = arith.maximumf %36, %38 : vector<1x128xf32>
    %40 = arith.subf %0, %39 : vector<1x128xf32>
    %41 = math.exp %40 : vector<1x128xf32>
    %c1_i32_10 = arith.constant 1 : i32
    %42 = tpu.dynamic_rotate %41 by %c1_i32_10 dim 1 : vector<1x128xf32>, i32 -> vector<1x128xf32>
    %cst = arith.constant 0.000000e+00 : f32
    %43 = vector.broadcast %cst : f32 to vector<1x128xf32>
    %44 = arith.select %11, %42, %43 : vector<1x128xi1>, vector<1x128xf32>
    %45 = arith.addf %41, %44 : vector<1x128xf32>
    %c127_i32_11 = arith.constant 127 : i32
    %46 = tpu.dynamic_rotate %41 by %c127_i32_11 dim 1 : vector<1x128xf32>, i32 -> vector<1x128xf32>
    %cst_12 = arith.constant 0.000000e+00 : f32
    %47 = vector.broadcast %cst_12 : f32 to vector<1x128xf32>
    %48 = arith.select %13, %46, %47 : vector<1x128xi1>, vector<1x128xf32>
    %49 = arith.addf %41, %48 : vector<1x128xf32>
    %c2_i32_13 = arith.constant 2 : i32
    %50 = tpu.dynamic_rotate %45 by %c2_i32_13 dim 1 : vector<1x128xf32>, i32 -> vector<1x128xf32>
    %cst_14 = arith.constant 0.000000e+00 : f32
    %51 = vector.broadcast %cst_14 : f32 to vector<1x128xf32>
    %52 = arith.select %15, %50, %51 : vector<1x128xi1>, vector<1x128xf32>
    %53 = arith.addf %45, %52 : vector<1x128xf32>
    %c126_i32_15 = arith.constant 126 : i32
    %54 = tpu.dynamic_rotate %49 by %c126_i32_15 dim 1 : vector<1x128xf32>, i32 -> vector<1x128xf32>
    %cst_16 = arith.constant 0.000000e+00 : f32
    %55 = vector.broadcast %cst_16 : f32 to vector<1x128xf32>
    %56 = arith.select %17, %54, %55 : vector<1x128xi1>, vector<1x128xf32>
    %57 = arith.addf %49, %56 : vector<1x128xf32>
    %c4_i32_17 = arith.constant 4 : i32
    %58 = tpu.dynamic_rotate %53 by %c4_i32_17 dim 1 : vector<1x128xf32>, i32 -> vector<1x128xf32>
    %cst_18 = arith.constant 0.000000e+00 : f32
    %59 = vector.broadcast %cst_18 : f32 to vector<1x128xf32>
    %60 = arith.select %19, %58, %59 : vector<1x128xi1>, vector<1x128xf32>
    %61 = arith.addf %53, %60 : vector<1x128xf32>
    %c124_i32_19 = arith.constant 124 : i32
    %62 = tpu.dynamic_rotate %57 by %c124_i32_19 dim 1 : vector<1x128xf32>, i32 -> vector<1x128xf32>
    %cst_20 = arith.constant 0.000000e+00 : f32
    %63 = vector.broadcast %cst_20 : f32 to vector<1x128xf32>
    %64 = arith.select %21, %62, %63 : vector<1x128xi1>, vector<1x128xf32>
    %65 = arith.addf %57, %64 : vector<1x128xf32>
    %66 = arith.addf %61, %65 : vector<1x128xf32>
    %67 = arith.subf %66, %41 : vector<1x128xf32>
    %c1_i32_21 = arith.constant 1 : i32
    %68 = tpu.dynamic_rotate %1 by %c1_i32_21 dim 1 : vector<1x128xf32>, i32 -> vector<1x128xf32>
    %69 = arith.select %11, %68, %1 : vector<1x128xi1>, vector<1x128xf32>
    %70 = arith.maximumf %1, %69 : vector<1x128xf32>
    %c127_i32_22 = arith.constant 127 : i32
    %71 = tpu.dynamic_rotate %70 by %c127_i32_22 dim 1 : vector<1x128xf32>, i32 -> vector<1x128xf32>
    %72 = arith.select %13, %71, %70 : vector<1x128xi1>, vector<1x128xf32>
    %73 = arith.maximumf %70, %72 : vector<1x128xf32>
    %c2_i32_23 = arith.constant 2 : i32
    %74 = tpu.dynamic_rotate %73 by %c2_i32_23 dim 1 : vector<1x128xf32>, i32 -> vector<1x128xf32>
    %75 = arith.select %15, %74, %73 : vector<1x128xi1>, vector<1x128xf32>
    %76 = arith.maximumf %73, %75 : vector<1x128xf32>
    %c126_i32_24 = arith.constant 126 : i32
    %77 = tpu.dynamic_rotate %76 by %c126_i32_24 dim 1 : vector<1x128xf32>, i32 -> vector<1x128xf32>
    %78 = arith.select %17, %77, %76 : vector<1x128xi1>, vector<1x128xf32>
    %79 = arith.maximumf %76, %78 : vector<1x128xf32>
    %c4_i32_25 = arith.constant 4 : i32
    %80 = tpu.dynamic_rotate %79 by %c4_i32_25 dim 1 : vector<1x128xf32>, i32 -> vector<1x128xf32>
    %81 = arith.select %19, %80, %79 : vector<1x128xi1>, vector<1x128xf32>
    %82 = arith.maximumf %79, %81 : vector<1x128xf32>
    %c124_i32_26 = arith.constant 124 : i32
    %83 = tpu.dynamic_rotate %82 by %c124_i32_26 dim 1 : vector<1x128xf32>, i32 -> vector<1x128xf32>
    %84 = arith.select %21, %83, %82 : vector<1x128xi1>, vector<1x128xf32>
    %85 = arith.maximumf %82, %84 : vector<1x128xf32>
    %86 = arith.cmpf oeq, %1, %85 : vector<1x128xf32>
    %cst_27 = arith.constant 8.000000e+00 : f32
    %87 = vector.broadcast %cst_27 : f32 to vector<1x128xf32>
    %88 = arith.select %86, %5, %87 : vector<1x128xi1>, vector<1x128xf32>
    %c1_i32_28 = arith.constant 1 : i32
    %89 = tpu.dynamic_rotate %88 by %c1_i32_28 dim 1 : vector<1x128xf32>, i32 -> vector<1x128xf32>
    %90 = arith.select %11, %89, %88 : vector<1x128xi1>, vector<1x128xf32>
    %91 = arith.minimumf %88, %90 : vector<1x128xf32>
    %c127_i32_29 = arith.constant 127 : i32
    %92 = tpu.dynamic_rotate %91 by %c127_i32_29 dim 1 : vector<1x128xf32>, i32 -> vector<1x128xf32>
    %93 = arith.select %13, %92, %91 : vector<1x128xi1>, vector<1x128xf32>
    %94 = arith.minimumf %91, %93 : vector<1x128xf32>
    %c2_i32_30 = arith.constant 2 : i32
    %95 = tpu.dynamic_rotate %94 by %c2_i32_30 dim 1 : vector<1x128xf32>, i32 -> vector<1x128xf32>
    %96 = arith.select %15, %95, %94 : vector<1x128xi1>, vector<1x128xf32>
    %97 = arith.minimumf %94, %96 : vector<1x128xf32>
    %c126_i32_31 = arith.constant 126 : i32
    %98 = tpu.dynamic_rotate %97 by %c126_i32_31 dim 1 : vector<1x128xf32>, i32 -> vector<1x128xf32>
    %99 = arith.select %17, %98, %97 : vector<1x128xi1>, vector<1x128xf32>
    %100 = arith.minimumf %97, %99 : vector<1x128xf32>
    %c4_i32_32 = arith.constant 4 : i32
    %101 = tpu.dynamic_rotate %100 by %c4_i32_32 dim 1 : vector<1x128xf32>, i32 -> vector<1x128xf32>
    %102 = arith.select %19, %101, %100 : vector<1x128xi1>, vector<1x128xf32>
    %103 = arith.minimumf %100, %102 : vector<1x128xf32>
    %c124_i32_33 = arith.constant 124 : i32
    %104 = tpu.dynamic_rotate %103 by %c124_i32_33 dim 1 : vector<1x128xf32>, i32 -> vector<1x128xf32>
    %105 = arith.select %21, %104, %103 : vector<1x128xi1>, vector<1x128xf32>
    %106 = arith.minimumf %103, %105 : vector<1x128xf32>
    %107 = arith.cmpf oeq, %5, %106 : vector<1x128xf32>
    %cst_34 = arith.constant 0.000000e+00 : f32
    %108 = vector.broadcast %cst_34 : f32 to vector<1x128xf32>
    %109 = arith.select %107, %0, %108 : vector<1x128xi1>, vector<1x128xf32>
    %c1_i32_35 = arith.constant 1 : i32
    %110 = tpu.dynamic_rotate %109 by %c1_i32_35 dim 1 : vector<1x128xf32>, i32 -> vector<1x128xf32>
    %cst_36 = arith.constant 0.000000e+00 : f32
    %111 = vector.broadcast %cst_36 : f32 to vector<1x128xf32>
    %112 = arith.select %11, %110, %111 : vector<1x128xi1>, vector<1x128xf32>
    %113 = arith.addf %109, %112 : vector<1x128xf32>
    %c127_i32_37 = arith.constant 127 : i32
    %114 = tpu.dynamic_rotate %109 by %c127_i32_37 dim 1 : vector<1x128xf32>, i32 -> vector<1x128xf32>
    %cst_38 = arith.constant 0.000000e+00 : f32
    %115 = vector.broadcast %cst_38 : f32 to vector<1x128xf32>
    %116 = arith.select %13, %114, %115 : vector<1x128xi1>, vector<1x128xf32>
    %117 = arith.addf %109, %116 : vector<1x128xf32>
    %c2_i32_39 = arith.constant 2 : i32
    %118 = tpu.dynamic_rotate %113 by %c2_i32_39 dim 1 : vector<1x128xf32>, i32 -> vector<1x128xf32>
    %cst_40 = arith.constant 0.000000e+00 : f32
    %119 = vector.broadcast %cst_40 : f32 to vector<1x128xf32>
    %120 = arith.select %15, %118, %119 : vector<1x128xi1>, vector<1x128xf32>
    %121 = arith.addf %113, %120 : vector<1x128xf32>
    %c126_i32_41 = arith.constant 126 : i32
    %122 = tpu.dynamic_rotate %117 by %c126_i32_41 dim 1 : vector<1x128xf32>, i32 -> vector<1x128xf32>
    %cst_42 = arith.constant 0.000000e+00 : f32
    %123 = vector.broadcast %cst_42 : f32 to vector<1x128xf32>
    %124 = arith.select %17, %122, %123 : vector<1x128xi1>, vector<1x128xf32>
    %125 = arith.addf %117, %124 : vector<1x128xf32>
    %c4_i32_43 = arith.constant 4 : i32
    %126 = tpu.dynamic_rotate %121 by %c4_i32_43 dim 1 : vector<1x128xf32>, i32 -> vector<1x128xf32>
    %cst_44 = arith.constant 0.000000e+00 : f32
    %127 = vector.broadcast %cst_44 : f32 to vector<1x128xf32>
    %128 = arith.select %19, %126, %127 : vector<1x128xi1>, vector<1x128xf32>
    %129 = arith.addf %121, %128 : vector<1x128xf32>
    %c124_i32_45 = arith.constant 124 : i32
    %130 = tpu.dynamic_rotate %125 by %c124_i32_45 dim 1 : vector<1x128xf32>, i32 -> vector<1x128xf32>
    %cst_46 = arith.constant 0.000000e+00 : f32
    %131 = vector.broadcast %cst_46 : f32 to vector<1x128xf32>
    %132 = arith.select %21, %130, %131 : vector<1x128xi1>, vector<1x128xf32>
    %133 = arith.addf %125, %132 : vector<1x128xf32>
    %134 = arith.addf %129, %133 : vector<1x128xf32>
    %135 = arith.subf %134, %109 : vector<1x128xf32>
    %136 = math.log %67 : vector<1x128xf32>
    %137 = arith.addf %136, %39 : vector<1x128xf32>
    %138 = arith.subf %137, %135 : vector<1x128xf32>
    %139 = tpu.iota {dimensions = array<i32: 0>} : vector<128x16xi32>
    %140 = tpu.iota {dimensions = array<i32: 1>} : vector<128x16xi32>
    %c8_i32 = arith.constant 8 : i32
    %141 = vector.broadcast %c8_i32 : i32 to vector<128x16xi32>
    %142 = arith.muli %140, %141 : vector<128x16xi32>
    %143 = arith.cmpi eq, %139, %142 : vector<128x16xi32>
    %144 = arith.extui %143 : vector<128x16xi1> to vector<128x16xi32>
    %145 = arith.sitofp %144 : vector<128x16xi32> to vector<128x16xf32>
    %cst_47 = arith.constant dense<0.000000e+00> : vector<1x16xf32>
    %146 = tpu.matmul %138, %145, %cst_47 {dimension_numbers = #tpu.dot_dimension_numbers<[1], [0], [0], [1], [0, 0, 1, 1], [], []>, precision = #tpu.contract_precision<fp32>} : vector<1x128xf32>, vector<128x16xf32>, vector<1x16xf32> -> vector<1x16xf32>
    %c0_48 = arith.constant 0 : index
    %c0_49 = arith.constant 0 : index
    %147 = vector.load %arg3[%c0_48, %c0_49] : memref<1x16xf32, #tpu.memory_space<vmem>>, vector<1x16xf32>
    tpu.vector_store %arg3[%c0_48, %c0_49], %146 {strides = array<i32>} : memref<1x16xf32, #tpu.memory_space<vmem>>, vector<1x16xf32>,
    return
  }
  func.func @transform_0(%arg0: i32) -> (i32, i32) {
    %c0_i32 = arith.constant 0 : i32
    %c0_i32_0 = arith.constant 0 : i32
    return %arg0, %c0_i32 : i32, i32
  }
  func.func @transform_1(%arg0: i32) -> (i32, i32) {
    %c0_i32 = arith.constant 0 : i32
    %c0_i32_0 = arith.constant 0 : i32
    return %arg0, %c0_i32 : i32, i32
  }
  func.func @transform_2(%arg0: i32) -> (i32, i32) {
    %c0_i32 = arith.constant 0 : i32
    %c0_i32_0 = arith.constant 0 : i32
    return %arg0, %c0_i32 : i32, i32
  }
}

</mosaic_0001>

<bundles_post_ra>
// kernel: tpu_custom_call.1
= control target key start
LH: loop header
LB: loop body
LE: loop exit
PB: predicated region body
PF: predicated region fallthrough
CT: control target
= control target key end

     0   :  { %7 = vsyncpa [#allocation3], 0  ;;  %s2271_s0 = inlined_call_operand.hbm [shape: f32[1,128], index: 0, kind: input, shape index: {}]   ;;  %s2272_s1 = inlined_call_operand.vmem [shape: f32[1,128], index: 1, kind: input, shape index: {}]   ;;  %s2273_s2 = inlined_call_operand.hbm [shape: f32[1,16], index: 2, kind: output, shape index: {}]  }
   0x1   :  { %8 = vsyncpa [#allocation4], 0  ;;  %s1502_s9 = smov [#allocation2]   ;;  %s1454_s13 = scalar_lea.hbm %s2271_s0, 16 }
   0x2   :  { %s15_s10 = sshll.u32 %s1502_s9, 4  ;;  %p1455_p0 = scmp.ne.s32.totalorder %s2271_s0, %s1454_s13  ;;  %s16_s10 = int_to_ptr.vmem [resolvable:$true] %s15_s10 }
   0x3   :  { %p1458_p1 = scmp.lt.u32.totalorder %s1454_s13, %s2271_s0 }
   0x5   :  { %p1460_p2 = pnand %p1458_p1, %p1455_p0 }
   0x7   :  { %1463 = shalt.err (!%p1460_p2)
}
   0x8   :  { %s1464_s18 = scalar_lea.vmem %s16_s10, 16  ;;  %s1468_s19 = scalar_lea.vmem %s16_s10, 32 }
   0x9   :  { %p1465_p3 = scmp.ne.s32.totalorder %s16_s10, %s1464_s18  ;;  %p1469_p4 = scmp.lt.s32.totalorder %s16_s10, %s16_s10 }
   0xa   :  { %p1470_p5 = scmp.lt.s32.totalorder %s1468_s19, %s1464_s18 }
   0xc   :  { %p1471_p6 = por %p1470_p5, %p1469_p4 }
   0xe   :  { %p1472_p7 = pnand %p1471_p6, %p1465_p3 }
  0x10   :  { %1475 = shalt.err (!%p1472_p7)
}
  0x11   :  { %18 = dma.hbm_to_vmem [thread:$0]  %s2271_s0, 16, %s16_s10, [#allocation3]  }
  0x12   :  { %1498 = dma.done.wait [#allocation3], 16  }
  0x13   :  { %1499 = vsyncadd [#allocation3], 4294967280  ;;  %v26_v0 = vlaneseq  ;;  %s1503_s22 = smov 1   ;;  %s1504_s23 = smov 127   ;;  %v1557_v5 = vld [vmem:[%s2272_s1] sm:$0x1] }
  0x14   :  { %s1505_s25 = smov 2   ;;  %s1506_s26 = smov 126   ;;  %v1569_v6 = vld [vmem:[#allocation2] sm:$0x1] }
  0x15   :  { %v1542_v1 = vand.u32 127, %v26_v0  ;;  %s1507_s27 = smov 4   ;;  %s1508_s28 = smov 124  }
  0x16   :  { %s1513_s1 = smov [#allocation5]  }
  0x17   :  { %v28_v2 = vand.u32 7, %v1542_v1  ;;  %s900_s29 = sshll.u32 %s1513_s1, 4  ;;  %s901_s29 = int_to_ptr.vmem [resolvable:$true] %s900_s29 }
  0x18   :  { %s1476_s30 = scalar_lea.vmem %s901_s29, 16  ;;  %s1480_s3 = scalar_lea.vmem %s901_s29, 32 }
  0x19   :  { %v30_v3 = vsub.s32 %v1542_v1, %v28_v2  ;;  %v29_v51 = vcvt.s32.f32 %v28_v2  ;;  %p1477_p8 = scmp.ne.s32.totalorder %s901_s29, %s1476_s30  ;;  %p1481_p9 = scmp.lt.s32.totalorder %s901_s29, %s901_s29 }
  0x1a   :  { %p1482_p10 = scmp.lt.s32.totalorder %s1480_s3, %s1476_s30 }
  0x1b   :  { %v1548_v4 = vcvt.s32.f32 %v30_v3 }
  0x1c   :  { %p1483_p11 = por %p1482_p10, %p1481_p9 }
  0x1d   :  { %32 = vrot.lane.b32.xlu0 %v1548_v4, %s1503_s22  ;;  %35 = vrot.lane.b32.xlu1 %v1548_v4, %s1504_s23 }
  0x1e   :  { %p1484_p12 = pnand %p1483_p11, %p1477_p8 }
  0x21   :  { %103 = vrot.lane.b32.xlu0 %v1557_v5, %s1503_s22 }
  0x25   :  { %38 = vrot.lane.b32.xlu0 %v1548_v4, %s1505_s25 }
  0x29   :  { %41 = vrot.lane.b32.xlu0 %v1548_v4, %s1506_s26 }
  0x2d   :  { %44 = vrot.lane.b32.xlu0 %v1548_v4, %s1507_s27 }
  0x31   :  { %47 = vrot.lane.b32.xlu0 %v1548_v4, %s1508_s28 }
  0x35   :  { %50 = vrot.lane.b32.xlu0 %v1569_v6, %s1503_s22 }
  0x8f   :  { %v33_v7 = vpop.permute.xlu0 %32  ;;  %v36_v19 = vpop.permute.xlu1 %35 }
  0x90   :  { %vm1574_vm0 = vcmp.eq.f32.partialorder %v33_v7, %v1548_v4  ;;  %vm1589_vm1 = vcmp.eq.f32.partialorder %v36_v19, %v1548_v4 }
  0x93   :  { %v104_v9 = vpop.permute.xlu0 %103 }
  0x94   :  { %v105_v10 = vsel %vm1574_vm0, %v104_v9, %v1557_v5 }
  0x95   :  { %v106_v11 = vmax.f32 %v1557_v5, %v105_v10 }
  0x97   :  { %107 = vrot.lane.b32.xlu1 %v106_v11, %s1504_s23  ;;  %v39_v12 = vpop.permute.xlu0 %38 }
  0x98   :  { %vm1600_vm2 = vcmp.eq.f32.partialorder %v39_v12, %v1548_v4 }
  0x9b   :  { %v42_v13 = vpop.permute.xlu0 %41 }
  0x9c   :  { %vm1611_vm3 = vcmp.eq.f32.partialorder %v42_v13, %v1548_v4 }
  0x9f   :  { %v45_v14 = vpop.permute.xlu0 %44 }
  0xa0   :  { %vm1622_vm4 = vcmp.eq.f32.partialorder %v45_v14, %v1548_v4 }
  0xa3   :  { %v48_v15 = vpop.permute.xlu0 %47 }
  0xa4   :  { %vm1633_vm5 = vcmp.eq.f32.partialorder %v48_v15, %v1548_v4 }
  0xa7   :  { %v51_v16 = vpop.permute.xlu0 %50 }
  0xa8   :  { %v52_v17 = vsel %vm1574_vm0, %v51_v16, %v1569_v6 }
  0xa9   :  { %v53_v18 = vmax.f32 %v1569_v6, %v52_v17 }
  0xab   :  { %54 = vrot.lane.b32.xlu0 %v53_v18, %s1504_s23 }
 0x109   :  { %v108_v21 = vpop.permute.xlu1 %107 }
 0x10a   :  { %v109_v22 = vsel %vm1589_vm1, %v108_v21, %v106_v11 }
 0x10b   :  { %v110_v23 = vmax.f32 %v106_v11, %v109_v22 }
 0x10d   :  { %111 = vrot.lane.b32.xlu1 %v110_v23, %s1505_s25 }
 0x11d   :  { %v55_v24 = vpop.permute.xlu0 %54 }
 0x11e   :  { %v56_v25 = vsel %vm1589_vm1, %v55_v24, %v53_v18 }
 0x11f   :  { %v57_v26 = vmax.f32 %v53_v18, %v56_v25 }
 0x121   :  { %58 = vrot.lane.b32.xlu0 %v57_v26, %s1505_s25 }
 0x17f   :  { %v112_v28 = vpop.permute.xlu1 %111 }
 0x180   :  { %v113_v29 = vsel %vm1600_vm2, %v112_v28, %v110_v23 }
 0x181   :  { %v114_v30 = vmax.f32 %v110_v23, %v113_v29 }
 0x183   :  { %115 = vrot.lane.b32.xlu1 %v114_v30, %s1506_s26 }
 0x193   :  { %v59_v31 = vpop.permute.xlu0 %58 }
 0x194   :  { %v60_v32 = vsel %vm1600_vm2, %v59_v31, %v57_v26 }
 0x195   :  { %v61_v33 = vmax.f32 %v57_v26, %v60_v32 }
 0x197   :  { %62 = vrot.lane.b32.xlu0 %v61_v33, %s1506_s26 }
 0x1f5   :  { %v116_v35 = vpop.permute.xlu1 %115 }
 0x1f6   :  { %v117_v36 = vsel %vm1611_vm3, %v116_v35, %v114_v30 }
 0x1f7   :  { %v118_v37 = vmax.f32 %v114_v30, %v117_v36 }
 0x1f9   :  { %119 = vrot.lane.b32.xlu1 %v118_v37, %s1507_s27 }
 0x209   :  { %v63_v38 = vpop.permute.xlu0 %62 }
 0x20a   :  { %v64_v39 = vsel %vm1611_vm3, %v63_v38, %v61_v33  ;;  %v1717_v38 = vmul.u32 8, %v1542_v1 }
 0x20b   :  { %v65_v40 = vmax.f32 %v61_v33, %v64_v39 }
 0x20d   :  { %66 = vrot.lane.b32.xlu0 %v65_v40, %s1507_s27 }
 0x26b   :  { %v120_v42 = vpop.permute.xlu1 %119 }
 0x26c   :  { %v121_v43 = vsel %vm1622_vm4, %v120_v42, %v118_v37 }
 0x26d   :  { %v122_v44 = vmax.f32 %v118_v37, %v121_v43  ;;  %v1714_v37 = vshrl.u32 %v26_v0, 7 }
 0x26f   :  { %123 = vrot.lane.b32.xlu1 %v122_v44, %s1508_s28  ;;  %v187_v39 = vadd.s32 8, %v1714_v37  ;;  %vm203_vm8 = vcmp.eq.s32.totalorder %v1714_v37, %v1717_v38  ;;  %v1725_v42 = vadd.s32 16, %v1714_v37  ;;  %v1728_v43 = vadd.s32 24, %v1714_v37 }
 0x270   :  { %v1732_v0 = vadd.s32 32, %v1714_v37  ;;  %v1735_v1 = vadd.s32 40, %v1714_v37 }
 0x271   :  { %vm204_vm9 = vcmp.eq.s32.totalorder %v187_v39, %v1717_v38  ;;  %vm205_vm11 = vcmp.eq.s32.totalorder %v1725_v42, %v1717_v38  ;;  %vm206_vm12 = vcmp.eq.s32.totalorder %v1728_v43, %v1717_v38 }
 0x272   :  { %vm1742_vm10 = vmpackc.low %vm204_vm9, %vm203_vm8  ;;  %vm2275_vm14 = vcmp.eq.s32.totalorder %v1732_v0, %v1717_v38  ;;  %vm2274_vm15 = vcmp.eq.s32.totalorder %v1735_v1, %v1717_v38 }
 0x273   :  { %vm1763_vm13 = vmpackc.low %vm206_vm12, %vm205_vm11 }
 0x27f   :  { %v67_v45 = vpop.permute.xlu0 %66 }
 0x280   :  { %v68_v46 = vsel %vm1622_vm4, %v67_v45, %v65_v40  ;;  %v2282_v45 = vmov 1.0|1.0  }
 0x281   :  { %v69_v47 = vmax.f32 %v65_v40, %v68_v46  ;;  %v1509_v40 = vmov 0.0|0.0  }
 0x282   :  { %1357 = vmatprep.subr.bf16.mxu0 %v1509_v40  ;;  %1285 = vmatprep.subr.bf16.mxu1 %v1509_v40 }
 0x283   :  { %70 = vrot.lane.b32.xlu0 %v69_v47, %s1508_s28  ;;  %1359 = vmatpush3.bf16.msk.msra.mxu0 %vm1742_vm10, %v2282_v45 }
 0x284   :  { %1287 = vmatpush3.bf16.msk.msra.mxu1 %vm1742_vm10, %v2282_v45  ;;  %1360 = vmatprep.subr.bf16.mxu0 %v1509_v40 }
 0x285   :  { %1288 = vmatprep.subr.bf16.mxu1 %v1509_v40 }
 0x287   :  { %1362 = vmatpush3.bf16.msk.msra.mxu0 %vm1763_vm13, %v2282_v45 }
 0x288   :  { %1290 = vmatpush3.bf16.msk.msra.mxu1 %vm1763_vm13, %v2282_v45  ;;  %1363 = vmatprep.subr.bf16.mxu0 %v1509_v40 }
 0x289   :  { %1291 = vmatprep.subr.bf16.mxu1 %v1509_v40 }
 0x2e1   :  { %v124_v49 = vpop.permute.xlu1 %123 }
 0x2e2   :  { %v125_v50 = vsel %vm1633_vm5, %v124_v49, %v122_v44  ;;  %v1776_v49 = vadd.s32 56, %v1714_v37 }
 0x2e3   :  { %v126_v52 = vmax.f32 %v122_v44, %v125_v50 }
 0x2e5   :  { %vm127_vm6 = vcmp.eq.f32.partialorder %v1557_v5, %v126_v52  ;;  %v1804_v52 = vadd.s32 72, %v1714_v37 }
 0x2e6   :  { %v128_v53 = vsel %vm127_vm6, %v29_v51, 8.0  ;;  %vm2276_vm6 = vcmp.eq.s32.totalorder %v1776_v49, %v1717_v38 }
 0x2e7   :  { %129 = vrot.lane.b32.xlu1 %v128_v53, %s1503_s22 }
 0x2f5   :  { %v71_v54 = vpop.permute.xlu0 %70 }
 0x2f6   :  { %v72_v55 = vsel %vm1633_vm5, %v71_v54, %v69_v47 }
 0x2f7   :  { %v1645_v56 = vmax.f32 %v69_v47, %v72_v55  ;;  %v1773_v47 = vadd.s32 48, %v1714_v37  ;;  %v1511_v55 = vmov 0.0  }
 0x2f9   :  { %v74_v57 = vsub.f32 %v1569_v6, %v1645_v56 }
 0x2fb   :  { %v75_v58 = vmul.f32 1.442695, %v74_v57  ;;  %v909_v57 = vsel %vm203_vm8, 1.0, %v1511_v55 }
 0x2fd   :  { %1450 = vpow2.f32 %v75_v58  ;;  %v910_v58 = vsel %vm204_vm9, 1.0, %v1511_v55 }
 0x307   :  { %v1649_v59 = vpop.eup %1450 }
 0x308   :  { %77 = vrot.lane.b32.xlu0 %v1649_v59, %s1503_s22 }
 0x359   :  { %v130_v60 = vpop.permute.xlu1 %129 }
 0x35a   :  { %v131_v61 = vsel %vm1574_vm0, %v130_v60, %v128_v53  ;;  %v1862_v60 = vadd.s32 80, %v1714_v37 }
 0x35b   :  { %v132_v62 = vmin.f32 %v128_v53, %v131_v61  ;;  %v1865_v61 = vadd.s32 88, %v1714_v37 }
 0x35d   :  { %133 = vrot.lane.b32.xlu1 %v132_v62, %s1504_s23 }
 0x37a   :  { %v78_v17 = vpop.permute.xlu0 %77 }
 0x37b   :  { %v79_v21 = vsel %vm1574_vm0, %v78_v17, 0.0 }
 0x37c   :  { %v80_v24 = vadd.f32 %v1649_v59, %v79_v21 }
 0x3cf   :  { %v134_v63 = vpop.permute.xlu1 %133 }
 0x3d0   :  { %v135_v2 = vsel %vm1589_vm1, %v134_v63, %v132_v62  ;;  %v1873_v63 = vsub.f32 %v910_v58, %v910_v58 }
 0x3d1   :  { %v136_v3 = vmin.f32 %v132_v62, %v135_v2  ;;  %v1871_v62 = vsub.f32 %v909_v57, %v909_v57 }
 0x3d3   :  { %137 = vrot.lane.b32.xlu1 %v136_v3, %s1505_s25 }
 0x445   :  { %v138_v4 = vpop.permute.xlu1 %137 }
 0x446   :  { %v139_v5 = vsel %vm1600_vm2, %v138_v4, %v136_v3  ;;  %v1895_v4 = vadd.s32 104, %v1714_v37 }
 0x447   :  { %v140_v7 = vmin.f32 %v136_v3, %v139_v5  ;;  %v1892_v3 = vadd.s32 96, %v1714_v37  ;;  %v345_v5 = vand.u32 4294901760, %v1871_v62 }
 0x449   :  { %141 = vrot.lane.b32.xlu1 %v140_v7, %s1506_s26  ;;  %vm215_vm9 = vcmp.eq.s32.totalorder %v1892_v3, %v1717_v38 }
 0x4bb   :  { %v142_v9 = vpop.permute.xlu1 %141 }
 0x4bc   :  { %v143_v10 = vsel %vm1611_vm3, %v142_v9, %v140_v7  ;;  %v911_v9 = vsel %vm205_vm11, 1.0, %v1511_v55  ;;  %vm2310_vm11 = vcmp.eq.s32.totalorder %v1732_v0, %v1717_v38 }
 0x4bd   :  { %v144_v11 = vmin.f32 %v140_v7, %v143_v10  ;;  %v352_v7 = vand.u32 4294901760, %v1873_v63  ;;  %v913_v34 = vsel %vm2310_vm11, 1.0, %v1511_v55 }
 0x4bf   :  { %145 = vrot.lane.b32.xlu1 %v144_v11, %s1507_s27  ;;  %v353_v21 = vsub.f32 %v1873_v63, %v352_v7 }
 0x531   :  { %v146_v12 = vpop.permute.xlu1 %145 }
 0x532   :  { %v147_v13 = vsel %vm1622_vm4, %v146_v12, %v144_v11  ;;  %v1931_v12 = vadd.s32 112, %v1714_v37 }
 0x533   :  { %v148_v14 = vmin.f32 %v144_v11, %v147_v13  ;;  %v912_v11 = vsel %vm206_vm12, 1.0, %v1511_v55  ;;  %v1934_v13 = vadd.s32 120, %v1714_v37 }
 0x535   :  { %149 = vrot.lane.b32.xlu1 %v148_v14, %s1508_s28  ;;  %vm2281_vm12 = vcmp.eq.s32.totalorder %v1934_v13, %v1717_v38 }
 0x539   :  { %81 = vrot.lane.b32.xlu1 %v1649_v59, %s1504_s23 }
 0x5a7   :  { %v150_v15 = vpop.permute.xlu1 %149 }
 0x5a8   :  { %v151_v16 = vsel %vm1633_vm5, %v150_v15, %v148_v14 }
 0x5a9   :  { %v152_v18 = vmin.f32 %v148_v14, %v151_v16  ;;  %v1937_v16 = vsub.f32 %v911_v9, %v911_v9 }
 0x5ab   :  { %vm153_vm7 = vcmp.eq.f32.partialorder %v29_v51, %v152_v18  ;;  %v82_v19 = vpop.permute.xlu1 %81  ;;  %v1801_v51 = vadd.s32 64, %v1714_v37 }
 0x5ac   :  { %v83_v22 = vsel %vm1589_vm1, %v82_v19, 0.0  ;;  %v1677_v23 = vsel %vm153_vm7, %v1569_v6, 0.0  ;;  %v346_v19 = vsub.f32 %v1871_v62, %v345_v5 }
 0x5ad   :  { %159 = vrot.lane.b32.xlu1 %v1677_v23, %s1504_s23  ;;  %155 = vrot.lane.b32.xlu0 %v1677_v23, %s1503_s22  ;;  %v84_v25 = vadd.f32 %v1649_v59, %v83_v22 }
 0x5b1   :  { %89 = vrot.lane.b32.xlu1 %v84_v25, %s1506_s26  ;;  %85 = vrot.lane.b32.xlu0 %v80_v24, %s1505_s25 }
 0x61f   :  { %v160_v26 = vpop.permute.xlu1 %159  ;;  %v156_v28 = vpop.permute.xlu0 %155 }
 0x620   :  { %v161_v6 = vsel %vm1589_vm1, %v160_v26, 0.0  ;;  %v157_v29 = vsel %vm1574_vm0, %v156_v28, 0.0  ;;  %vm1791_vm0 = vmpackc.low %vm2274_vm15, %vm2275_vm14  ;;  %vm209_vm1 = vcmp.eq.s32.totalorder %v1773_v47, %v1717_v38  ;;  %vm2278_vm15 = vcmp.eq.s32.totalorder %v1801_v51, %v1717_v38 }
 0x621   :  { %v1692_v30 = vadd.f32 %v161_v6, %v1677_v23  ;;  %v1695_v31 = vadd.f32 %v157_v29, %v1677_v23  ;;  %1365 = vmatpush3.bf16.msk.msra.mxu0 %vm1791_vm0, %v2282_v45  ;;  %1293 = vmatpush3.bf16.msk.msra.mxu1 %vm1791_vm0, %v2282_v45  ;;  %vm1819_vm7 = vmpackc.low %vm2276_vm6, %vm209_vm1  ;;  %vm2277_vm14 = vcmp.eq.s32.totalorder %v1804_v52, %v1717_v38  ;;  %v347_v6 = vand.u32 4294901760, %v346_v19 }
 0x622   :  { %1366 = vmatprep.subr.bf16.mxu0 %v1509_v40  ;;  %1294 = vmatprep.subr.bf16.mxu1 %v1509_v40  ;;  %vm1841_vm6 = vmpackc.low %vm2277_vm14, %vm2278_vm15  ;;  %vm2280_vm14 = vcmp.eq.s32.totalorder %v1862_v60, %v1717_v38  ;;  %vm2279_vm15 = vcmp.eq.s32.totalorder %v1865_v61, %v1717_v38  ;;  %v1979_v28 = vpack.c.bf16 %v352_v7, %v345_v5  ;;  %v354_v29 = vand.u32 4294901760, %v353_v21 }
 0x623   :  { %167 = vrot.lane.b32.xlu1 %v1692_v30, %s1506_s26  ;;  %v90_v32 = vpop.permute.xlu1 %89  ;;  %163 = vrot.lane.b32.xlu0 %v1695_v31, %s1505_s25  ;;  %v86_v33 = vpop.permute.xlu0 %85  ;;  %vm1881_vm8 = vmpackc.low %vm2279_vm15, %vm2280_vm14  ;;  %vm216_vm15 = vcmp.eq.s32.totalorder %v1895_v4, %v1717_v38 }
 0x624   :  { %v91_v20 = vsel %vm1611_vm3, %v90_v32, 0.0  ;;  %v87_v8 = vsel %vm1600_vm2, %v86_v33, 0.0  ;;  %vm1915_vm14 = vmpackc.low %vm216_vm15, %vm215_vm9  ;;  %v915_v32 = vsel %vm209_vm1, 1.0, %v1511_v55  ;;  %v2007_v37 = vpack.c.bf16 %v354_v29, %v347_v6 }
 0x625   :  { %v1705_v35 = vadd.f32 %v91_v20, %v84_v25  ;;  %v1707_v36 = vadd.f32 %v87_v8, %v80_v24  ;;  %1368 = vmatpush3.bf16.msk.msra.mxu0 %vm1819_vm7, %v2282_v45  ;;  %1296 = vmatpush3.bf16.msk.msra.mxu1 %vm1819_vm7, %v2282_v45  ;;  %v1951_v25 = vsub.f32 %v912_v11, %v912_v11  ;;  %v359_v20 = vand.u32 4294901760, %v1937_v16 }
 0x626   :  { %1369 = vmatprep.subr.bf16.mxu0 %v1509_v40  ;;  %1297 = vmatprep.subr.bf16.mxu1 %v1509_v40  ;;  %v2013_v0 = vsub.f32 %v915_v32, %v915_v32  ;;  %vm2315_vm1 = vcmp.eq.s32.totalorder %v1801_v51, %v1717_v38 }
 0x627   :  { %97 = vrot.lane.b32.xlu1 %v1705_v35, %s1508_s28  ;;  %93 = vrot.lane.b32.xlu0 %v1707_v36, %s1507_s27  ;;  %v366_v8 = vand.u32 4294901760, %v1951_v25  ;;  %v360_v42 = vsub.f32 %v1937_v16, %v359_v20  ;;  %v917_v47 = vsel %vm2315_vm1, 1.0, %v1511_v55  ;;  %vm2317_vm1 = vcmp.eq.s32.totalorder %v1862_v60, %v1717_v38 }
 0x628   :  { %v387_v21 = vand.u32 4294901760, %v2013_v0  ;;  %v2322_v44 = vpack.c.bf16 %v1951_v25, %v1937_v16 }
 0x629   :  { %1371 = vmatpush3.bf16.msk.msra.mxu0 %vm1841_vm6, %v2282_v45  ;;  %1299 = vmatpush3.bf16.msk.msra.mxu1 %vm1841_vm6, %v2282_v45  ;;  %v2009_v39 = vpack.c.bf16 %v366_v8, %v359_v20  ;;  %v367_v43 = vsub.f32 %v1951_v25, %v366_v8  ;;  %v361_v57 = vand.u32 4294901760, %v360_v42  ;;  %v921_v20 = vsel %vm215_vm9, 1.0, %v1511_v55 }
 0x62a   :  { %1372 = vmatprep.subr.bf16.mxu0 %v1509_v40  ;;  %1300 = vmatprep.subr.bf16.mxu1 %v1509_v40  ;;  %v388_v32 = vsub.f32 %v2013_v0, %v387_v21 }
 0x62b   :  { %v368_v58 = vand.u32 4294901760, %v367_v43 }
 0x62c   :  { %v389_v8 = vand.u32 4294901760, %v388_v32 }
 0x62d   :  { %1374 = vmatpush3.bf16.msk.msra.mxu0 %vm1881_vm8, %v2282_v45  ;;  %1302 = vmatpush3.bf16.msk.msra.mxu1 %vm1881_vm8, %v2282_v45  ;;  %v2027_v9 = vpack.c.bf16 %v368_v58, %v361_v57 }
 0x62e   :  { %1375 = vmatprep.subr.bf16.mxu0 %v1509_v40  ;;  %1303 = vmatprep.subr.bf16.mxu1 %v1509_v40 }
 0x631   :  { %1377 = vmatpush3.bf16.msk.msra.mxu0 %vm1915_vm14, %v2282_v45  ;;  %1305 = vmatpush3.bf16.msk.msra.mxu1 %vm1915_vm14, %v2282_v45 }
 0x632   :  { %1378 = vmatprep.subr.bf16.mxu0 %v1509_v40  ;;  %1306 = vmatprep.subr.bf16.mxu1 %v1509_v40 }
 0x695   :  { %v168_v14 = vpop.permute.xlu1 %167  ;;  %v164_v15 = vpop.permute.xlu0 %163 }
 0x696   :  { %v169_v17 = vsel %vm1611_vm3, %v168_v14, 0.0  ;;  %v165_v18 = vsel %vm1600_vm2, %v164_v15, 0.0  ;;  %vm2311_vm2 = vcmp.eq.s32.totalorder %v1735_v1, %v1717_v38  ;;  %vm217_vm3 = vcmp.eq.s32.totalorder %v1931_v12, %v1717_v38 }
 0x697   :  { %v1946_v22 = vadd.f32 %v169_v17, %v1692_v30  ;;  %v1949_v24 = vadd.f32 %v165_v18, %v1695_v31  ;;  %v914_v27 = vsel %vm2311_vm2, 1.0, %v1511_v55  ;;  %vm1975_vm11 = vmpackc.low %vm2281_vm12, %vm217_vm3  ;;  %vm1512_vm2 = vmmov 0  }
 0x698   :  { %1380 = vmatpush3.bf16.msk.msra.mxu0 %vm1975_vm11, %v2282_v45  ;;  %1212 = vmatprep.mubr.msk.f32.mxu0 %vm1512_vm2, %v1511_v55  ;;  %v1986_v30 = vsub.f32 %v913_v34, %v913_v34  ;;  %v1988_v31 = vsub.f32 %v914_v27, %v914_v27  ;;  %vm2314_vm12 = vcmp.eq.s32.totalorder %v1776_v49, %v1717_v38 }
 0x699   :  { %175 = vrot.lane.b32.xlu1 %v1946_v22, %s1508_s28  ;;  %171 = vrot.lane.b32.xlu0 %v1949_v24, %s1507_s27  ;;  %v916_v33 = vsel %vm2314_vm12, 1.0, %v1511_v55  ;;  %vm2316_vm12 = vcmp.eq.s32.totalorder %v1804_v52, %v1717_v38  ;;  %v2033_v15 = vsub.f32 %v917_v47, %v917_v47  ;;  %v919_v52 = vsel %vm2317_vm1, 1.0, %v1511_v55 }
 0x69a   :  { %1381 = vmatprep.subr.bf16.mxu0 %v1509_v40  ;;  %1308 = vmatpush3.bf16.msk.msra.mxu1 %vm1975_vm11, %v2282_v45  ;;  %v2015_v1 = vsub.f32 %v916_v33, %v916_v33  ;;  %v918_v49 = vsel %vm2316_vm12, 1.0, %v1511_v55  ;;  %v373_v5 = vand.u32 4294901760, %v1986_v30  ;;  %v380_v7 = vand.u32 4294901760, %v1988_v31 }
 0x69b   :  { %1107 = vmatprep.mubr.msk.f32.mxu1 %vm1512_vm2, %v1511_v55  ;;  %1309 = vmatprep.subr.bf16.mxu1 %v1509_v40  ;;  %v2035_v17 = vsub.f32 %v918_v49, %v918_v49  ;;  %vm2318_vm12 = vcmp.eq.s32.totalorder %v1865_v61, %v1717_v38  ;;  %v2053_v33 = vsub.f32 %v919_v52, %v919_v52  ;;  %v922_v61 = vsel %vm216_vm15, 1.0, %v1511_v55 }
 0x69c   :  { %v2029_v11 = vpack.c.bf16 %v380_v7, %v373_v5  ;;  %v374_v14 = vsub.f32 %v1986_v30, %v373_v5  ;;  %v381_v51 = vsub.f32 %v1988_v31, %v380_v7  ;;  %v394_v34 = vand.u32 4294901760, %v2015_v1 }
 0x69d   :  { %v920_v27 = vsel %vm2318_vm12, 1.0, %v1511_v55  ;;  %v401_v43 = vand.u32 4294901760, %v2033_v15  ;;  %v408_v47 = vand.u32 4294901760, %v2035_v17  ;;  %v2073_v7 = vsub.f32 %v921_v20, %v921_v20 }
 0x69e   :  { %v375_v18 = vand.u32 4294901760, %v374_v14  ;;  %v382_v19 = vand.u32 4294901760, %v381_v51  ;;  %v2049_v29 = vpack.c.bf16 %v394_v34, %v387_v21  ;;  %v395_v60 = vsub.f32 %v2015_v1, %v394_v34 }
 0x69f   :  { %v2065_v49 = vsub.f32 %v920_v27, %v920_v27  ;;  %v2069_v58 = vpack.c.bf16 %v408_v47, %v401_v43  ;;  %v402_v3 = vsub.f32 %v2033_v15, %v401_v43  ;;  %v409_v5 = vsub.f32 %v2035_v17, %v408_v47 }
 0x6a0   :  { %v2047_v6 = vpack.c.bf16 %v382_v19, %v375_v18  ;;  %v396_v42 = vand.u32 4294901760, %v395_v60  ;;  %v2075_v4 = vsub.f32 %v922_v61, %v922_v61  ;;  %v923_v14 = vsel %vm217_vm3, 1.0, %v1511_v55 }
 0x6a1   :  { %v403_v51 = vand.u32 4294901760, %v402_v3  ;;  %v410_v52 = vand.u32 4294901760, %v409_v5  ;;  %v415_v18 = vand.u32 4294901760, %v2053_v33  ;;  %vm2319_vm15 = vcmp.eq.s32.totalorder %v1934_v13, %v1717_v38 }
 0x6a2   :  { %v2067_v57 = vpack.c.bf16 %v396_v42, %v389_v8  ;;  %v924_v19 = vsel %vm2319_vm15, 1.0, %v1511_v55  ;;  %v422_v21 = vand.u32 4294901760, %v2065_v49  ;;  %v2090_v32 = vsub.f32 %v923_v14, %v923_v14 }
 0x6a3   :  { %v2087_v34 = vpack.c.bf16 %v410_v52, %v403_v51  ;;  %v416_v27 = vsub.f32 %v2053_v33, %v415_v18  ;;  %v2095_v20 = vsub.f32 %v924_v19, %v924_v19  ;;  %v429_v8 = vand.u32 4294901760, %v2073_v7 }
 0x6a4   :  { %v2092_v60 = vpack.c.bf16 %v422_v21, %v415_v18  ;;  %v423_v12 = vsub.f32 %v2065_v49, %v422_v21  ;;  %v436_v38 = vand.u32 4294901760, %v2075_v4  ;;  %v443_v51 = vand.u32 4294901760, %v2090_v32 }
 0x6a5   :  { %v417_v61 = vand.u32 4294901760, %v416_v27  ;;  %v430_v43 = vsub.f32 %v2073_v7, %v429_v8  ;;  %v450_v52 = vand.u32 4294901760, %v2095_v20  ;;  %v2324_v46 = vpack.c.bf16 %v2015_v1, %v2013_v0 }
 0x6a6   :  { %v424_v13 = vand.u32 4294901760, %v423_v12  ;;  %v2099_v42 = vpack.c.bf16 %v436_v38, %v429_v8  ;;  %v437_v47 = vsub.f32 %v2075_v4, %v436_v38  ;;  %v444_v21 = vsub.f32 %v2090_v32, %v443_v51 }
 0x6a7   :  { %v431_v5 = vand.u32 4294901760, %v430_v43  ;;  %v2109_v19 = vpack.c.bf16 %v450_v52, %v443_v51  ;;  %v451_v27 = vsub.f32 %v2095_v20, %v450_v52  ;;  %v98_v52 = vpop.permute.xlu1 %97  ;;  %v2325_v50 = vpack.c.bf16 %v2035_v17, %v2033_v15 }
 0x6a8   :  { %v2103_v3 = vpack.c.bf16 %v424_v13, %v417_v61  ;;  %v438_v14 = vand.u32 4294901760, %v437_v47  ;;  %v445_v12 = vand.u32 4294901760, %v444_v21  ;;  %v94_v21 = vpop.permute.xlu0 %93  ;;  %v2326_v53 = vpack.c.bf16 %v2065_v49, %v2053_v33 }
 0x6a9   :  { %v452_v8 = vand.u32 4294901760, %v451_v27  ;;  %v99_v27 = vsel %vm1633_vm5, %v98_v52, 0.0  ;;  %v2327_v54 = vpack.c.bf16 %v2075_v4, %v2073_v7 }
 0x6aa   :  { %v2107_v18 = vpack.c.bf16 %v438_v14, %v431_v5 }
 0x6ab   :  { %v2113_v45 = vpack.c.bf16 %v452_v8, %v445_v12  ;;  %v95_v12 = vsel %vm1622_vm4, %v94_v21, 0.0  ;;  %v100_v8 = vadd.f32 %v99_v27, %v1705_v35 }
 0x6ac   :  { %v96_v47 = vadd.f32 %v95_v12, %v1707_v36 }
 0x6ae   :  { %v101_v43 = vadd.f32 %v100_v8, %v96_v47 }
 0x6b0   :  { %v102_v5 = vsub.f32 %v101_v43, %v1649_v59 }
 0x6b2   :  { %1452 = vlog2.f32 %v102_v5 }
 0x6bc   :  { %v1453_v14 = vpop.eup %1452 }
 0x6bd   :  { %v182_v61 = vmul.f32 0.6931472, %v1453_v14 }
 0x6bf   :  { %v183_v36 = vadd.f32 %v182_v61, %v1645_v56 }
 0x70b   :  { %v176_v13 = vpop.permute.xlu1 %175  ;;  %v172_v38 = vpop.permute.xlu0 %171 }
 0x70c   :  { %v177_v51 = vsel %vm1633_vm5, %v176_v13, 0.0  ;;  %v173_v52 = vsel %vm1622_vm4, %v172_v38, 0.0  ;;  %vm892_vm4 = vcmask 122880  }
 0x70d   :  { %v178_v21 = vadd.f32 %v177_v51, %v1946_v22  ;;  %v174_v35 = vadd.f32 %v173_v52, %v1949_v24  ;;  %v2321_v22 = vpack.c.bf16 %v1873_v63, %v1871_v62 }
 0x70f   :  { %v179_v27 = vadd.f32 %v178_v21, %v174_v35 }
 0x711   :  { %v180_v59 = vsub.f32 %v179_v27, %v1677_v23  ;;  %v2320_v23 = vmov 1.0|1.0  }
 0x713   :  { %v184_v43 = vsub.f32 %v183_v36, %v180_v59 }
 0x715   :  { %v2146_v47 = vand.u32 4294901760, %v184_v43 }
 0x717   :  { %v2149_v5 = vsub.f32 %v184_v43, %v2146_v47 }
 0x719   :  { %v334_v48 = vand.u32 4294901760, %v2149_v5 }
 0x71b   :  { %1213 = vmatmul.mubr.f32.vlgmr.msra.gmra.mrb[0].mxu0 %v334_v48  ;;  %v335_v41 = vsub.f32 %v2149_v5, %v334_v48 }
 0x71c   :  { %1383 = vmatpush3.bf16.msra.mxu0 %v1979_v28  ;;  %1247 = vmatprep.mubr.msk.f32.mxu0 %vm1512_vm2, %v1511_v55 }
 0x71d   :  { %1384 = vmatprep.subr.bf16.mxu0 %v1509_v40  ;;  %v336_v56 = vand.u32 4294901760, %v335_v41 }
 0x71f   :  { %1108 = vmatmul.mubr.f32.vlgmr.msra.gmra.mrb[0].mxu1 %v336_v56 }
 0x720   :  { %1311 = vmatpush3.bf16.msra.mxu1 %v2007_v37  ;;  %1386 = vmatpush3.bf16.msra.mxu0 %v2009_v39 }
 0x721   :  { %1312 = vmatprep.subr.bf16.mxu1 %v1509_v40  ;;  %1387 = vmatprep.subr.bf16.mxu0 %v1509_v40 }
 0x722   :  { %1142 = vmatprep.mubr.msk.f32.mxu1 %vm1512_vm2, %v1511_v55 }
 0x724   :  { %1314 = vmatpush3.bf16.msra.mxu1 %v2027_v9  ;;  %1389 = vmatpush3.bf16.msra.mxu0 %v2029_v11 }
 0x725   :  { %1315 = vmatprep.subr.bf16.mxu1 %v1509_v40  ;;  %1390 = vmatprep.subr.bf16.mxu0 %v1509_v40 }
 0x728   :  { %1317 = vmatpush3.bf16.msra.mxu1 %v2047_v6  ;;  %1392 = vmatpush3.bf16.msra.mxu0 %v2049_v29 }
 0x729   :  { %1318 = vmatprep.subr.bf16.mxu1 %v1509_v40  ;;  %1393 = vmatprep.subr.bf16.mxu0 %v1509_v40 }
 0x72c   :  { %1320 = vmatpush3.bf16.msra.mxu1 %v2067_v57  ;;  %1395 = vmatpush3.bf16.msra.mxu0 %v2069_v58 }
 0x72d   :  { %1321 = vmatprep.subr.bf16.mxu1 %v1509_v40  ;;  %1396 = vmatprep.subr.bf16.mxu0 %v1509_v40 }
 0x730   :  { %1323 = vmatpush3.bf16.msra.mxu1 %v2087_v34  ;;  %1398 = vmatpush3.bf16.msra.mxu0 %v2092_v60 }
 0x731   :  { %1324 = vmatprep.subr.bf16.mxu1 %v1509_v40  ;;  %1399 = vmatprep.subr.bf16.mxu0 %v1509_v40 }
 0x734   :  { %1326 = vmatpush3.bf16.msra.mxu1 %v2103_v3  ;;  %1401 = vmatpush3.bf16.msra.mxu0 %v2099_v42 }
 0x735   :  { %1327 = vmatprep.subr.bf16.mxu1 %v1509_v40  ;;  %1402 = vmatprep.subr.bf16.mxu0 %v1509_v40 }
 0x738   :  { %1329 = vmatpush3.bf16.msra.mxu1 %v2107_v18  ;;  %1404 = vmatpush3.bf16.msra.mxu0 %v2109_v19 }
 0x739   :  { %1330 = vmatprep.subr.bf16.mxu1 %v1509_v40  ;;  %1405 = vmatprep.subr.bf16.mxu0 %v1509_v40 }
 0x73b   :  { %1248 = vmatmul.mubr.f32.vlgmr.msra.gmra.mrb[0].mxu0 %v2146_v47 }
 0x73c   :  { %1332 = vmatpush3.bf16.msra.mxu1 %v2113_v45  ;;  %1407 = vmatpush3.bf16.msk.msra.mxu0 %vm1742_vm10, %v2320_v23  ;;  %v2323_v45 = vpack.c.bf16 %v1988_v31, %v1986_v30 }
 0x73d   :  { %1333 = vmatprep.subr.bf16.mxu1 %v1509_v40  ;;  %1408 = vmatprep.subr.bf16.mxu0 %v1509_v40 }
 0x73e   :  { %1282 = vmatprep.mubr.msk.f32.mxu0 %vm1512_vm2, %v1511_v55 }
 0x73f   :  { %1143 = vmatmul.mubr.f32.vlgmr.msra.gmra.mrb[0].mxu1 %v2146_v47 }
 0x740   :  { %1335 = vmatpush3.bf16.msra.mxu1 %v2321_v22  ;;  %1410 = vmatpush3.bf16.msk.msra.mxu0 %vm1763_vm13, %v2320_v23 }
 0x741   :  { %1336 = vmatprep.subr.bf16.mxu1 %v1509_v40  ;;  %1411 = vmatprep.subr.bf16.mxu0 %v1509_v40 }
 0x742   :  { %1177 = vmatprep.mubr.msk.f32.mxu1 %vm1512_vm2, %v1511_v55  ;;  %v2328_v55 = vpack.c.bf16 %v2095_v20, %v2090_v32 }
 0x744   :  { %1338 = vmatpush3.bf16.msra.mxu1 %v2322_v44  ;;  %1413 = vmatpush3.bf16.msk.msra.mxu0 %vm1791_vm0, %v2320_v23 }
 0x745   :  { %1339 = vmatprep.subr.bf16.mxu1 %v1509_v40  ;;  %1414 = vmatprep.subr.bf16.mxu0 %v1509_v40 }
 0x748   :  { %1341 = vmatpush3.bf16.msra.mxu1 %v2323_v45  ;;  %1416 = vmatpush3.bf16.msk.msra.mxu0 %vm1819_vm7, %v2320_v23 }
 0x749   :  { %1342 = vmatprep.subr.bf16.mxu1 %v1509_v40  ;;  %1417 = vmatprep.subr.bf16.mxu0 %v1509_v40 }
 0x74c   :  { %1344 = vmatpush3.bf16.msra.mxu1 %v2324_v46  ;;  %1419 = vmatpush3.bf16.msk.msra.mxu0 %vm1841_vm6, %v2320_v23 }
 0x74d   :  { %1345 = vmatprep.subr.bf16.mxu1 %v1509_v40  ;;  %1420 = vmatprep.subr.bf16.mxu0 %v1509_v40 }
 0x750   :  { %1347 = vmatpush3.bf16.msra.mxu1 %v2325_v50  ;;  %1422 = vmatpush3.bf16.msk.msra.mxu0 %vm1881_vm8, %v2320_v23 }
 0x751   :  { %1348 = vmatprep.subr.bf16.mxu1 %v1509_v40  ;;  %1423 = vmatprep.subr.bf16.mxu0 %v1509_v40 }
 0x754   :  { %1350 = vmatpush3.bf16.msra.mxu1 %v2326_v53  ;;  %1425 = vmatpush3.bf16.msk.msra.mxu0 %vm1915_vm14, %v2320_v23 }
 0x755   :  { %1351 = vmatprep.subr.bf16.mxu1 %v1509_v40  ;;  %1426 = vmatprep.subr.bf16.mxu0 %v1509_v40 }
 0x758   :  { %1353 = vmatpush3.bf16.msra.mxu1 %v2327_v54  ;;  %1428 = vmatpush3.bf16.msk.msra.mxu0 %vm1975_vm11, %v2320_v23 }
 0x759   :  { %1354 = vmatprep.subr.bf16.mxu1 %v1509_v40 }
 0x75b   :  { %1283 = vmatmul.mubr.f32.vlgmr.msra.gmra.mrb[0].mxu0 %v2146_v47 }
 0x75c   :  { %1356 = vmatpush3.bf16.msra.mxu1 %v2328_v55 }
 0x75f   :  { %1178 = vmatmul.mubr.f32.vlgmr.msra.gmra.mrb[0].mxu1 %v2149_v5 }
 0x82e   :  { %v888_v62 = vpop.f32.mrb[0].mxu0 }
 0x82f   :  { %v1284_v63 = vpop.f32.mrb[1].mxu0 }
 0x832   :  { %v593_v2 = vpop.f32.mrb[0].mxu1 }
 0x833   :  { %v1429_v10 = vadd.f32 %v888_v62, %v593_v2  ;;  %v1179_v16 = vpop.f32.mrb[1].mxu1 }
 0x835   :  { %893 = vst.msk [vmem:[#allocation5] sm:$0x1] %vm892_vm4, %v1429_v10 }
 0x836   :  { %1487 = shalt.err (!%p1484_p12)
}
 0x837   :  { %s1488_s6 = scalar_lea.hbm %s2273_s2, 16 }
 0x838   :  { %p1489_p13 = scmp.ne.s32.totalorder %s2273_s2, %s1488_s6  ;;  %p1492_p0 = scmp.lt.u32.totalorder %s1488_s6, %s2273_s2 }
 0x83a   :  { %p1494_p1 = pnand %p1492_p0, %p1489_p13 }
 0x83c   :  { %1497 = shalt.err (!%p1494_p1)
}
 0x83d   :  { %903 = dma.vmem_to_hbm [thread:$0]  %s901_s29, 16, %s2273_s2, [#allocation4]  }
 0x83e   :  { %1500 = dma.done.wait [#allocation4], 16  }
 0x83f   :  { %1501 = vsyncadd [#allocation4], 4294967280 }
 0x840   :  { %907 = vsyncpa [#allocation3], 1 }
 0x841   :  { %908 = vsyncpa [#allocation4], 1 }

</bundles_post_ra>
